<compile_context>
chip_gen: v7x
topology: tpu7x:2x2x1
jax: 0.10.0
libtpu: 0.0.40
codegen_flags: <defaults>
</compile_context>

<pallas_src>
import functools

import jax
import jax.numpy as jnp
from jax.experimental import pallas as pl
from jax.experimental.pallas import tpu as pltpu


def _round_up(x, m):
    return (x + m - 1) // m * m


def _cdiv(a, b):
    return (a + b - 1) // b


def _balanced_tile(dim, cap, align):
    """Largest tile <= cap (multiple of `align`) with balanced chunks.

    Returns (tile, padded_dim) with padded_dim = n_chunks * tile >= dim and
    minimal padding (avoids the ~2x blow-up of round_up(dim, cap))."""
    dim_al = _round_up(max(dim, 1), align)
    cap = max(align, _round_up(cap, align) if cap >= align else align)
    n_chunks = max(1, _cdiv(dim_al, cap))
    tile = _round_up(_cdiv(dim_al, n_chunks), align)
    return tile, n_chunks * tile


def _vmem_budget():
    """~80% of physical per-core VMEM (v5e/v6e: ~102 MiB, v7x: ~51 MiB)."""
    cap = 64 * 1024 * 1024  # conservative fallback = v7x physical VMEM
    try:
        info = pltpu.get_tpu_info()
        cap = int(getattr(info, "vmem_capacity_bytes", cap))
    except Exception:
        pass
    return int(cap * 0.80)


def _mlp_kernel(x_ref, w1_ref, b1_ref, w2_ref, b2_ref, o_ref, acc_ref, *,
                approximate):
    j = pl.program_id(2)

    @pl.when(j == 0)
    def _init():
        acc_ref[...] = jnp.zeros_like(acc_ref)

    # Cast the row tile to the compute dtype in VMEM (no extra HBM pass).
    x = x_ref[...].astype(w1_ref.dtype)

    # fc1 for this hidden chunk: full d_in contraction -> exact per-chunk
    # result.  bf16 inputs, f32 accumulation on the MXU.
    h = jnp.dot(x, w1_ref[...], preferred_element_type=jnp.float32)
    h = h + b1_ref[...]                         # f32 bias
    h = jax.nn.gelu(h, approximate=approximate)  # tanh -> EUP, erf -> VALU poly
    # dropout -> identity (eval mode)

    # fc2 partial contraction over this hidden chunk, accumulated in f32.
    acc_ref[...] += jnp.dot(h.astype(w2_ref.dtype), w2_ref[...],
                            preferred_element_type=jnp.float32)

    @pl.when(j == pl.num_programs(2) - 1)
    def _finalize():
        o_ref[...] = (acc_ref[...] + b2_ref[...]).astype(o_ref.dtype)


def make_mlp_pallas(w1, b1, w2, b2, *, compute_dtype=jnp.bfloat16,
                    gelu_approximate=None):
    """Prepare (pad + cast) the weights once; return `apply(x)`.

    Weights are stored pre-transposed: w1 [d_in, hidden], w2 [hidden, d_out].
    """
    d_in, hidden = w1.shape
    d_out = w2.shape[1]
    assert b1.shape == (hidden,) and w2.shape[0] == hidden and b2.shape == (d_out,)

    if gelu_approximate is None:
        # Small d_in -> kernel tends to be VALU-bound; tanh GELU routes the
        # transcendental to the EUP slot (co-issues with MXU).  Numerics differ
        # marginally from torch's exact-erf default.
        gelu_approximate = d_in < 512

    budget = _vmem_budget()
    cb = jnp.dtype(compute_dtype).itemsize
    h128 = _round_up(hidden, 128)
    n128 = _round_up(d_out, 128)

    # --- hidden / output tile selection (independent of x) -------------------
    weights_dbuf = 2 * (d_in * h128 + h128 * n128) * cb  # double-buffered
    if weights_dbuf <= budget // 2:
        # Fast path: weights fully VMEM-resident.  grid_j == grid_n == 1 so the
        # W1/W2 block indices never change and the pipeline fetches them once.
        th, h_pad = h128, h128
        tn, n_pad = n128, n128
    else:
        # Streaming path: chunk the hidden dim (reduction axis); tile the
        # output columns too when d_out is very wide (extra parallel axis).
        th_cap, tn_cap = 512, 2048
        while True:
            th, h_pad = _balanced_tile(hidden, th_cap, 128)
            tn, n_pad = _balanced_tile(d_out, tn_cap, 128)
            fixed = 2 * (d_in * th + th * tn) * cb
            min_rows = 16 * (2 * d_in * 4 + 2 * tn * 4 + tn * 4)
            if budget - fixed >= min_rows:
                break
            if tn_cap > 128:
                tn_cap //= 2
            elif th_cap > 128:
                th_cap //= 2
            else:
                break  # give up shrinking; rely on the compiler's vmem limit

    fixed_vmem = 2 * (d_in * th + th * tn) * cb
    grid_n = n_pad // tn
    grid_j = h_pad // th

    # --- one-time weight pad + cast (hoisted out of the per-call path) -------
    w1c = jnp.pad(w1, ((0, 0), (0, h_pad - hidden))).astype(compute_dtype)
    b1f = jnp.pad(b1, (0, h_pad - hidden)).astype(jnp.float32).reshape(1, h_pad)
    w2c = jnp.pad(w2, ((0, h_pad - hidden), (0, n_pad - d_out))).astype(compute_dtype)
    b2f = jnp.pad(b2, (0, n_pad - d_out)).astype(jnp.float32).reshape(1, n_pad)
    # (zero-padded hidden units: b1=0, gelu(0)=0 -> contribute nothing to fc2)

    kernel = functools.partial(_mlp_kernel, approximate=bool(gelu_approximate))

    def apply(x):
        orig_shape = x.shape
        assert orig_shape[-1] == d_in
        out_dtype = x.dtype
        x2d = x.reshape(-1, d_in)
        m = x2d.shape[0]

        x_bytes = x2d.dtype.itemsize
        out_bytes = jnp.dtype(out_dtype).itemsize

        # Row tile: as large as the remaining VMEM budget allows (fewer row
        # tiles => less weight re-streaming), balanced to avoid padding blowup.
        per_row = 2 * d_in * x_bytes + 2 * tn * out_bytes + tn * 4
        rem = max(budget - fixed_vmem, per_row * 16)
        tm_cap = max(16, min(1024, (rem // per_row) // 16 * 16))
        tm, m_pad = _balanced_tile(m, tm_cap, 16)
        if m_pad != m:
            x2d = jnp.pad(x2d, ((0, m_pad - m), (0, 0)))
        grid_i = m_pad // tm
        grid = (grid_i, grid_n, grid_j)

        # Cost estimate matching the actual streaming pattern: weight blocks
        # are re-fetched whenever their block index changes between grid steps.
        w1_bytes = d_in * h_pad * cb * (1 if grid_j == 1 else grid_i * grid_n)
        w2_bytes = h_pad * n_pad * cb * (1 if (grid_j == 1 and grid_n == 1)
                                         else grid_i)
        cost = pl.CostEstimate(
            flops=int(2 * m_pad * (d_in * h_pad * grid_n + h_pad * n_pad)),
            transcendentals=int(m_pad * h_pad * grid_n),
            bytes_accessed=int(m_pad * d_in * x_bytes + w1_bytes + w2_bytes
                               + h_pad * 4 + n_pad * 4
                               + m_pad * n_pad * out_bytes),
        )

        out = pl.pallas_call(
            kernel,
            out_shape=jax.ShapeDtypeStruct((m_pad, n_pad), out_dtype),
            grid_spec=pltpu.PrefetchScalarGridSpec(
                num_scalar_prefetch=0,
                grid=grid,
                in_specs=[
                    pl.BlockSpec((tm, d_in), lambda i, n, j: (i, 0)),   # x rows
                    pl.BlockSpec((d_in, th), lambda i, n, j: (0, j)),   # W1 chunk
                    pl.BlockSpec((1, th), lambda i, n, j: (0, j)),      # b1 chunk
                    pl.BlockSpec((th, tn), lambda i, n, j: (j, n)),     # W2 chunk
                    pl.BlockSpec((1, tn), lambda i, n, j: (0, n)),      # b2 chunk
                ],
                out_specs=pl.BlockSpec((tm, tn), lambda i, n, j: (i, n)),
                scratch_shapes=[pltpu.VMEM((tm, tn), jnp.float32)],
            ),
            compiler_params=pltpu.CompilerParams(
                dimension_semantics=("parallel", "parallel", "arbitrary"),
                vmem_limit_bytes=int(budget),
            ),
            cost_estimate=cost,
        )(x2d, w1c, b1f, w2c, b2f)

        out = out[:m, :d_out]
        return out.reshape(*orig_shape[:-1], d_out)

    return apply


def mlp_pallas(x, w1, b1, w2, b2, **kwargs):
    """Convenience one-shot call: fc2(gelu(fc1(x))) with eval-mode dropout."""
    return make_mlp_pallas(w1, b1, w2, b2, **kwargs)(x)


def _init_params(key, in_features, hidden_features, out_features, dtype=jnp.float32):
    """Deterministic synthetic init (uniform like torch Linear default bounds)."""
    k1, k2, k3, k4 = jax.random.split(key, 4)
    lim1 = 1.0 / (in_features ** 0.5)
    lim2 = 1.0 / (hidden_features ** 0.5)
    # stored pre-transposed: [in, out]
    w1 = jax.random.uniform(k1, (in_features, hidden_features), dtype, -lim1, lim1)
    b1 = jax.random.uniform(k2, (hidden_features,), dtype, -lim1, lim1)
    w2 = jax.random.uniform(k3, (hidden_features, out_features), dtype, -lim2, lim2)
    b2 = jax.random.uniform(k4, (out_features,), dtype, -lim2, lim2)
    return w1, b1, w2, b2


if __name__ == "__main__":
    key = jax.random.PRNGKey(0)
    kx, kp = jax.random.split(key)

    batch, seq = 2, 8
    in_features, hidden_features, out_features = 32, 64, 32

    x = jax.random.normal(kx, (batch, seq, in_features), jnp.float32)
    w1, b1, w2, b2 = _init_params(kp, in_features, hidden_features, out_features)

    mlp = make_mlp_pallas(w1, b1, w2, b2)   # weights padded/cast once here
    out = jax.block_until_ready(mlp(x))

    # Reference emulating the kernel's bf16-input / f32-accumulate matmuls and
    # its GELU flavor (auto-gated: tanh for small d_in).
    approx = in_features < 512
    bf = lambda a: a.astype(jnp.bfloat16).astype(jnp.float32)
    ref_h = jax.nn.gelu(bf(x) @ bf(w1) + b1, approximate=approx)
    ref = bf(ref_h) @ bf(w2) + b2

    assert out.shape == (batch, seq, out_features)
    assert jnp.allclose(out, ref, atol=2e-2, rtol=2e-2), "mismatch vs reference"

    print("KERNEL_OK")
</pallas_src>

<mosaic_0001>
module attributes {stable_mosaic.version = 11 : i64} {
  func.func @_mlp_kernel(%arg0: i32, %arg1: i32, %arg2: i32, %arg3: memref<16x32xf32, #tpu.memory_space<vmem>>, %arg4: memref<32x128xbf16, #tpu.memory_space<vmem>>, %arg5: memref<1x128xf32, #tpu.memory_space<vmem>>, %arg6: memref<128x128xbf16, #tpu.memory_space<vmem>>, %arg7: memref<1x128xf32, #tpu.memory_space<vmem>>, %arg8: memref<16x128xf32, #tpu.memory_space<vmem>>, %arg9: memref<16x128xf32, #tpu.memory_space<vmem>>) attributes {dimension_semantics = [#tpu.dimension_semantics<parallel>, #tpu.dimension_semantics<parallel>, #tpu.dimension_semantics<arbitrary>], iteration_bounds = array<i64: 1, 1, 1>, scalar_prefetch = 0 : i64, scratch_operands = 1 : i64, tpu.core_type = #tpu.core_type<tc>, window_params = [{transform_indices = @transform_0, window_bounds = array<i64: 16, 32>}, {transform_indices = @transform_1, window_bounds = array<i64: 32, 128>}, {transform_indices = @transform_2, window_bounds = array<i64: 1, 128>}, {transform_indices = @transform_3, window_bounds = array<i64: 128, 128>}, {transform_indices = @transform_4, window_bounds = array<i64: 1, 128>}, {transform_indices = @transform_5, window_bounds = array<i64: 16, 128>}]} {
    %c0_i32 = arith.constant 0 : i32
    %0 = arith.cmpi eq, %arg2, %c0_i32 : i32
    %1 = arith.extui %0 : i1 to i32
    %c0_i32_0 = arith.constant 0 : i32
    %2 = arith.cmpi ne, %1, %c0_i32_0 : i32
    scf.if %2 {
      %cst_19 = arith.constant 0.000000e+00 : f32
      %32 = vector.broadcast %cst_19 : f32 to vector<16x128xf32>
      %c0_20 = arith.constant 0 : index
      %c0_21 = arith.constant 0 : index
      %33 = vector.load %arg9[%c0_20, %c0_21] : memref<16x128xf32, #tpu.memory_space<vmem>>, vector<16x128xf32>
      tpu.vector_store %arg9[%c0_20, %c0_21], %32 {strides = array<i32>} : memref<16x128xf32, #tpu.memory_space<vmem>>, vector<16x128xf32>,
    } else {
    }
    %c0 = arith.constant 0 : index
    %c0_1 = arith.constant 0 : index
    %3 = vector.load %arg3[%c0, %c0_1] : memref<16x32xf32, #tpu.memory_space<vmem>>, vector<16x32xf32>
    %4 = arith.truncf %3 : vector<16x32xf32> to vector<16x32xbf16>
    %c0_2 = arith.constant 0 : index
    %c0_3 = arith.constant 0 : index
    %5 = vector.load %arg4[%c0_2, %c0_3] : memref<32x128xbf16, #tpu.memory_space<vmem>>, vector<32x128xbf16>
    %cst = arith.constant dense<0.000000e+00> : vector<16x128xf32>
    %6 = tpu.matmul %4, %5, %cst {dimension_numbers = #tpu.dot_dimension_numbers<[1], [0], [0], [1], [0, 0, 1, 1], [], []>} : vector<16x32xbf16>, vector<32x128xbf16>, vector<16x128xf32> -> vector<16x128xf32>
    %c0_4 = arith.constant 0 : index
    %c0_5 = arith.constant 0 : index
    %7 = vector.load %arg5[%c0_4, %c0_5] : memref<1x128xf32, #tpu.memory_space<vmem>>, vector<1x128xf32>
    %8 = vector.broadcast %7 : vector<1x128xf32> to vector<16x128xf32>
    %9 = arith.addf %6, %8 : vector<16x128xf32>
    %10 = arith.mulf %9, %9 : vector<16x128xf32>
    %11 = arith.mulf %9, %10 : vector<16x128xf32>
    %cst_6 = arith.constant 4.471500e-02 : f32
    %12 = vector.broadcast %cst_6 : f32 to vector<16x128xf32>
    %13 = arith.mulf %12, %11 : vector<16x128xf32>
    %14 = arith.addf %9, %13 : vector<16x128xf32>
    %cst_7 = arith.constant 0.797884583 : f32
    %15 = vector.broadcast %cst_7 : f32 to vector<16x128xf32>
    %16 = arith.mulf %15, %14 : vector<16x128xf32>
    %17 = math.tanh %16 : vector<16x128xf32>
    %cst_8 = arith.constant 1.000000e+00 : f32
    %18 = vector.broadcast %cst_8 : f32 to vector<16x128xf32>
    %19 = arith.addf %18, %17 : vector<16x128xf32>
    %cst_9 = arith.constant 5.000000e-01 : f32
    %20 = vector.broadcast %cst_9 : f32 to vector<16x128xf32>
    %21 = arith.mulf %20, %19 : vector<16x128xf32>
    %22 = arith.mulf %9, %21 : vector<16x128xf32>
    %c0_10 = arith.constant 0 : index
    %c0_11 = arith.constant 0 : index
    %23 = vector.load %arg9[%c0_10, %c0_11] : memref<16x128xf32, #tpu.memory_space<vmem>>, vector<16x128xf32>
    %24 = arith.truncf %22 : vector<16x128xf32> to vector<16x128xbf16>
    %c0_12 = arith.constant 0 : index
    %c0_13 = arith.constant 0 : index
    %25 = vector.load %arg6[%c0_12, %c0_13] : memref<128x128xbf16, #tpu.memory_space<vmem>>, vector<128x128xbf16>
    %cst_14 = arith.constant dense<0.000000e+00> : vector<16x128xf32>
    %26 = tpu.matmul %24, %25, %cst_14 {dimension_numbers = #tpu.dot_dimension_numbers<[1], [0], [0], [1], [0, 0, 1, 1], [], []>} : vector<16x128xbf16>, vector<128x128xbf16>, vector<16x128xf32> -> vector<16x128xf32>
    %27 = arith.addf %23, %26 : vector<16x128xf32>
    %c0_15 = arith.constant 0 : index
    %c0_16 = arith.constant 0 : index
    %28 = vector.load %arg9[%c0_15, %c0_16] : memref<16x128xf32, #tpu.memory_space<vmem>>, vector<16x128xf32>
    tpu.vector_store %arg9[%c0_15, %c0_16], %27 {strides = array<i32>} : memref<16x128xf32, #tpu.memory_space<vmem>>, vector<16x128xf32>,
    %c0_i32_17 = arith.constant 0 : i32
    %29 = arith.cmpi eq, %arg2, %c0_i32_17 : i32
    %30 = arith.extui %29 : i1 to i32
    %c0_i32_18 = arith.constant 0 : i32
    %31 = arith.cmpi ne, %30, %c0_i32_18 : i32
    scf.if %31 {
      %c0_19 = arith.constant 0 : index
      %c0_20 = arith.constant 0 : index
      %32 = vector.load %arg9[%c0_19, %c0_20] : memref<16x128xf32, #tpu.memory_space<vmem>>, vector<16x128xf32>
      %c0_21 = arith.constant 0 : index
      %c0_22 = arith.constant 0 : index
      %33 = vector.load %arg7[%c0_21, %c0_22] : memref<1x128xf32, #tpu.memory_space<vmem>>, vector<1x128xf32>
      %34 = vector.broadcast %33 : vector<1x128xf32> to vector<16x128xf32>
      %35 = arith.addf %32, %34 : vector<16x128xf32>
      %c0_23 = arith.constant 0 : index
      %c0_24 = arith.constant 0 : index
      %36 = vector.load %arg8[%c0_23, %c0_24] : memref<16x128xf32, #tpu.memory_space<vmem>>, vector<16x128xf32>
      tpu.vector_store %arg8[%c0_23, %c0_24], %35 {strides = array<i32>} : memref<16x128xf32, #tpu.memory_space<vmem>>, vector<16x128xf32>,
    } else {
    }
    return
  }
  func.func @transform_0(%arg0: i32, %arg1: i32, %arg2: i32) -> (i32, i32) {
    %c0_i32 = arith.constant 0 : i32
    %c0_i32_0 = arith.constant 0 : i32
    return %arg0, %c0_i32 : i32, i32
  }
  func.func @transform_1(%arg0: i32, %arg1: i32, %arg2: i32) -> (i32, i32) {
    %c0_i32 = arith.constant 0 : i32
    %c0_i32_0 = arith.constant 0 : i32
    return %c0_i32, %arg2 : i32, i32
  }
  func.func @transform_2(%arg0: i32, %arg1: i32, %arg2: i32) -> (i32, i32) {
    %c0_i32 = arith.constant 0 : i32
    %c0_i32_0 = arith.constant 0 : i32
    return %c0_i32, %arg2 : i32, i32
  }
  func.func @transform_3(%arg0: i32, %arg1: i32, %arg2: i32) -> (i32, i32) {
    %c0_i32 = arith.constant 0 : i32
    return %arg2, %arg1 : i32, i32
  }
  func.func @transform_4(%arg0: i32, %arg1: i32, %arg2: i32) -> (i32, i32) {
    %c0_i32 = arith.constant 0 : i32
    %c0_i32_0 = arith.constant 0 : i32
    return %c0_i32, %arg1 : i32, i32
  }
  func.func @transform_5(%arg0: i32, %arg1: i32, %arg2: i32) -> (i32, i32) {
    %c0_i32 = arith.constant 0 : i32
    return %arg0, %arg1 : i32, i32
  }
}

</mosaic_0001>

<bundles_post_ra>
// kernel: tpu_custom_call.1
= control target key start
LH: loop header
LB: loop body
LE: loop exit
PB: predicated region body
PF: predicated region fallthrough
CT: control target
= control target key end

     0   :  { %10 = vsyncpa [#allocation4], 0  ;;  %s581_s0 = inlined_call_operand.hbm [shape: f32[16,32], index: 0, kind: input, shape index: {}]   ;;  %s582_s1 = inlined_call_operand.hbm [shape: bf16[32,128], index: 1, kind: input, shape index: {}]   ;;  %s583_s2 = inlined_call_operand.vmem [shape: f32[1,128], index: 2, kind: input, shape index: {}]   ;;  %s584_s3 = inlined_call_operand.hbm [shape: bf16[128,128], index: 3, kind: input, shape index: {}]   ;;  %s585_s4 = inlined_call_operand.vmem [shape: f32[1,128], index: 4, kind: input, shape index: {}]   ;;  %s586_s5 = inlined_call_operand.hbm [shape: f32[16,128], index: 5, kind: output, shape index: {}]  }
   0x1   :  { %11 = vsyncpa [#allocation7], 0 }
   0x2   :  { %12 = vsyncpa [#allocation5], 0  ;;  %s475_s18 = smov [#allocation6]   ;;  %s381_s22 = scalar_lea.hbm %s582_s1, 256 }
   0x3   :  { %s30_s19 = sshll.u32 %s475_s18, 4  ;;  %p382_p0 = scmp.ne.s32.totalorder %s582_s1, %s381_s22  ;;  %s31_s19 = int_to_ptr.vmem [resolvable:$true] %s30_s19 }
   0x4   :  { %p385_p1 = scmp.lt.u32.totalorder %s381_s22, %s582_s1 }
   0x6   :  { %p387_p2 = pnand %p385_p1, %p382_p0 }
   0x8   :  { %390 = shalt.err (!%p387_p2)
}
   0x9   :  { %s391_s27 = scalar_lea.vmem %s31_s19, 256  ;;  %p396_p4 = scmp.lt.s32.totalorder %s31_s19, %s31_s19 }
   0xa   :  { %p392_p3 = scmp.ne.s32.totalorder %s31_s19, %s391_s27  ;;  %p397_p5 = scmp.lt.s32.totalorder %s391_s27, %s391_s27 }
   0xc   :  { %p398_p6 = por %p397_p5, %p396_p4 }
   0xe   :  { %p399_p7 = pnand %p398_p6, %p392_p3 }
  0x10   :  { %402 = shalt.err (!%p399_p7)
}
  0x11   :  { %s476_s28 = smov 64   ;;  %s477_s29 = smov 4  }
  0x12   :  { %36 = dma.hbm_to_vmem [thread:$0]  %s582_s1, 256, %s31_s19, [#allocation7], %s476_s28, %s476_s28, %s477_s29  }
  0x13   :  { %s478_s7 = smov [#allocation3]   ;;  %s403_s11 = scalar_lea.hbm %s581_s0, 256 }
  0x14   :  { %s18_s8 = sshll.u32 %s478_s7, 4  ;;  %p404_p8 = scmp.ne.s32.totalorder %s581_s0, %s403_s11  ;;  %s19_s8 = int_to_ptr.vmem [resolvable:$true] %s18_s8 }
  0x15   :  { %p407_p9 = scmp.lt.u32.totalorder %s403_s11, %s581_s0 }
  0x17   :  { %p409_p10 = pnand %p407_p9, %p404_p8 }
  0x19   :  { %412 = shalt.err (!%p409_p10)
}
  0x1a   :  { %s413_s16 = scalar_lea.vmem %s19_s8, 256  ;;  %p418_p12 = scmp.lt.s32.totalorder %s19_s8, %s19_s8 }
  0x1b   :  { %p414_p11 = scmp.ne.s32.totalorder %s19_s8, %s413_s16  ;;  %p419_p13 = scmp.lt.s32.totalorder %s413_s16, %s413_s16 }
  0x1d   :  { %p420_p0 = por %p419_p13, %p418_p12 }
  0x1f   :  { %p421_p1 = pnand %p420_p0, %p414_p11 }
  0x21   :  { %424 = shalt.err (!%p421_p1)
}
  0x22   :  { %s479_s1 = smov 128   ;;  %s480_s17 = smov 8  }
  0x23   :  { %24 = dma.hbm_to_vmem [thread:$0]  %s581_s0, 256, %s19_s8, [#allocation4], %s479_s1, %s479_s1, %s480_s17  }
  0x24   :  { %s481_s20 = smov [#allocation8]   ;;  %s425_s24 = scalar_lea.hbm %s584_s3, 1024 }
  0x25   :  { %s44_s21 = sshll.u32 %s481_s20, 4  ;;  %p426_p2 = scmp.ne.s32.totalorder %s584_s3, %s425_s24  ;;  %s45_s21 = int_to_ptr.vmem [resolvable:$true] %s44_s21 }
  0x26   :  { %p429_p3 = scmp.lt.u32.totalorder %s425_s24, %s584_s3 }
  0x28   :  { %p431_p4 = pnand %p429_p3, %p426_p2 }
  0x2a   :  { %434 = shalt.err (!%p431_p4)
}
  0x2b   :  { %s435_s6 = scalar_lea.vmem %s45_s21, 1024  ;;  %p440_p6 = scmp.lt.s32.totalorder %s45_s21, %s45_s21 }
  0x2c   :  { %p436_p5 = scmp.ne.s32.totalorder %s45_s21, %s435_s6  ;;  %p441_p7 = scmp.lt.s32.totalorder %s435_s6, %s435_s6 }
  0x2e   :  { %p442_p8 = por %p441_p7, %p440_p6 }
  0x30   :  { %p443_p9 = pnand %p442_p8, %p436_p5 }
  0x32   :  { %446 = shalt.err (!%p443_p9)
}
  0x33   :  { %50 = dma.hbm_to_vmem [thread:$0]  %s584_s3, 1024, %s45_s21, [#allocation7], %s476_s28, %s476_s28, %s477_s29  }
  0x34   :  { %469 = dma.done.wait [#allocation4], 256  }
  0x35   :  { %470 = vsyncadd [#allocation4], 4294967040 }
  0x36   :  { %471 = dma.done.wait [#allocation7], 1280  }
  0x37   :  { %472 = vsyncadd [#allocation7], 4294966016  ;;  %v482_v0 = vmov 0.0   ;;  %vm483_vm0 = vmmov 0   ;;  %v367_v1 = vld [vmem:[#allocation6] sm:$0xff]   ;;  %v368_v2 = vld [vmem:[#allocation6 + $0x8] sm:$0xff]  }
  0x38   :  { %329 = vmatprep.subr.bf16.mxu0 %v482_v0  ;;  %333 = vmatprep.mubr.msk.bf16.mxu0 %vm483_vm0, %v482_v0  ;;  %v69_v3 = vld [vmem:[#allocation3] sm:$0xff]  ;;  %v70_v4 = vld [vmem:[#allocation3 + $0x8] sm:$0xff]  ;;  %vm95_vm1 = vcmask 261120   ;;  %v371_v8 = vld [vmem:[#allocation8 + $0x10] sm:$0xff]   ;;  %s484_s8 = smov [#allocation9]  }
  0x39   :  { %337 = vmatprep.subr.bf16.mxu1 %v482_v0  ;;  %353 = vmatprep.mubr.msk.bf16.mxu1 %vm483_vm0, %v482_v0  ;;  %v71_v5 = vpack.c.bf16 %v70_v4, %v69_v3  ;;  %v369_v6 = vld [vmem:[#allocation8] sm:$0xff]   ;;  %v370_v7 = vld [vmem:[#allocation8 + $0x8] sm:$0xff]   ;;  %v372_v9 = vld [vmem:[#allocation8 + $0x18] sm:$0xff]   ;;  %s291_s9 = sshll.u32 %s484_s8, 4  ;;  %s292_s9 = int_to_ptr.vmem [resolvable:$true] %s291_s9 }
  0x3a   :  { %330 = vmatpush3.bf16.msra.mxu0 %v367_v1  ;;  %338 = vmatpush3.bf16.msra.mxu1 %v369_v6  ;;  %v373_v10 = vld [vmem:[#allocation8 + $0x20] sm:$0xff]   ;;  %v374_v11 = vld [vmem:[#allocation8 + $0x28] sm:$0xff]   ;;  %v375_v12 = vld [vmem:[#allocation8 + $0x30] sm:$0xff]   ;;  %s447_s10 = scalar_lea.vmem %s292_s9, 256  ;;  %p452_p11 = scmp.lt.s32.totalorder %s292_s9, %s292_s9 }
  0x3b   :  { %331 = vmatprep.subr.bf16.mxu0 %v482_v0  ;;  %339 = vmatprep.subr.bf16.mxu1 %v482_v0  ;;  %v376_v13 = vld [vmem:[#allocation8 + $0x38] sm:$0xff]   ;;  %v304_v14 = vld [vmem:[%s583_s2] ss:$0 sm:$0xff]  ;;  %p448_p10 = scmp.ne.s32.totalorder %s292_s9, %s447_s10  ;;  %p453_p12 = scmp.lt.s32.totalorder %s447_s10, %s447_s10 }
  0x3c   :  { %v316_v40 = vld [vmem:[%s585_s4] ss:$0 sm:$0xff] }
  0x3d   :  { %p454_p13 = por %p453_p12, %p452_p11 }
  0x3e   :  { %332 = vmatpush3.bf16.msra.mxu0 %v368_v2  ;;  %340 = vmatpush3.bf16.msra.mxu1 %v370_v7 }
  0x3f   :  { %341 = vmatprep.subr.bf16.mxu1 %v482_v0  ;;  %p455_p0 = pnand %p454_p13, %p448_p10 }
  0x41   :  { %334 = vmatmul.mubr.msk.bf16.vlgmr.msra.gmra.mrb[0].mxu0 %vm95_vm1, %v71_v5 }
  0x42   :  { %342 = vmatpush3.bf16.msra.mxu1 %v371_v8 }
  0x43   :  { %343 = vmatprep.subr.bf16.mxu1 %v482_v0 }
  0x46   :  { %344 = vmatpush3.bf16.msra.mxu1 %v372_v9 }
  0x47   :  { %345 = vmatprep.subr.bf16.mxu1 %v482_v0 }
  0x4a   :  { %346 = vmatpush3.bf16.msra.mxu1 %v373_v10 }
  0x4b   :  { %347 = vmatprep.subr.bf16.mxu1 %v482_v0 }
  0x4e   :  { %348 = vmatpush3.bf16.msra.mxu1 %v374_v11 }
  0x4f   :  { %349 = vmatprep.subr.bf16.mxu1 %v482_v0 }
  0x52   :  { %350 = vmatpush3.bf16.msra.mxu1 %v375_v12 }
  0x53   :  { %351 = vmatprep.subr.bf16.mxu1 %v482_v0 }
  0x56   :  { %352 = vmatpush3.bf16.msra.mxu1 %v376_v13 }
 0x114   :  { %v133_v15 = vpop.f32.mrb[0].mxu0 }
 0x115   :  { %v134_v16 = vadd.f32 %v304_v14, %v133_v15  ;;  %v335_v17 = vpop.f32.mrb[1].mxu0 }
 0x116   :  { %v136_v18 = vpop.f32.mrb[2].mxu0 }
 0x117   :  { %v140_v19 = vmul.f32 %v134_v16, %v134_v16  ;;  %v137_v20 = vadd.f32 %v304_v14, %v136_v18  ;;  %v336_v21 = vpop.f32.mrb[3].mxu0 }
 0x119   :  { %v142_v22 = vmul.f32 %v140_v19, %v134_v16  ;;  %v141_v23 = vmul.f32 %v137_v20, %v137_v20 }
 0x11b   :  { %v144_v24 = vmul.f32 0.044715, %v142_v22  ;;  %v143_v25 = vmul.f32 %v141_v23, %v137_v20 }
 0x11d   :  { %v146_v26 = vadd.f32 %v144_v24, %v134_v16  ;;  %v145_v27 = vmul.f32 0.044715, %v143_v25 }
 0x11f   :  { %v148_v28 = vmul.f32 0.7978846, %v146_v26  ;;  %v147_v29 = vadd.f32 %v145_v27, %v137_v20 }
 0x121   :  { %377 = vtanh.f32 %v148_v28  ;;  %v149_v30 = vmul.f32 0.7978846, %v147_v29 }
 0x123   :  { %379 = vtanh.f32 %v149_v30 }
 0x12b   :  { %v378_v31 = vpop.eup %377 }
 0x12c   :  { %v152_v32 = vadd.f32 1.0, %v378_v31 }
 0x12d   :  { %v380_v33 = vpop.eup %379 }
 0x12e   :  { %v153_v34 = vadd.f32 1.0, %v380_v33  ;;  %v154_v35 = vmul.f32 0.5, %v152_v32 }
 0x130   :  { %v155_v36 = vmul.f32 0.5, %v153_v34  ;;  %v156_v37 = vmul.f32 %v154_v35, %v134_v16 }
 0x132   :  { %v157_v38 = vmul.f32 %v155_v36, %v137_v20 }
 0x134   :  { %v160_v39 = vpack.c.bf16 %v157_v38, %v156_v37 }
 0x136   :  { %354 = vmatmul.mubr.bf16.vlgmr.msra.gmra.mrb[0].mxu1 %v160_v39 }
 0x209   :  { %v259_v41 = vpop.f32.mrb[0].mxu1 }
 0x20a   :  { %v282_v42 = vadd.f32 %v316_v40, %v259_v41  ;;  %v355_v43 = vpop.f32.mrb[1].mxu1 }
 0x20b   :  { %v262_v44 = vpop.f32.mrb[2].mxu1 }
 0x20c   :  { %284 = vst [vmem:[#allocation9] sm:$0xff] %v282_v42  ;;  %v283_v45 = vadd.f32 %v316_v40, %v262_v44  ;;  %v356_v46 = vpop.f32.mrb[3].mxu1 }
 0x20e   :  { %285 = vst [vmem:[#allocation9 + $0x8] sm:$0xff] %v283_v45 }
 0x20f   :  { %458 = shalt.err (!%p455_p0)
}
 0x210   :  { %s459_s12 = scalar_lea.hbm %s586_s5, 256 }
 0x211   :  { %p460_p1 = scmp.ne.s32.totalorder %s586_s5, %s459_s12  ;;  %p463_p2 = scmp.lt.u32.totalorder %s459_s12, %s586_s5 }
 0x213   :  { %p465_p3 = pnand %p463_p2, %p460_p1 }
 0x215   :  { %468 = shalt.err (!%p465_p3)
}
 0x216   :  { %297 = dma.vmem_to_hbm [thread:$0]  %s292_s9, 256, %s586_s5, [#allocation5], %s479_s1, %s479_s1, %s480_s17  }
 0x217   :  { %473 = dma.done.wait [#allocation5], 256  }
 0x218   :  { %474 = vsyncadd [#allocation5], 4294967040 }
 0x219   :  { %301 = vsyncpa [#allocation4], 1 }
 0x21a   :  { %302 = vsyncpa [#allocation7], 1 }
 0x21b   :  { %303 = vsyncpa [#allocation5], 1 }

</bundles_post_ra>
